<compile_context>
chip_gen: v6e
topology: v6e:2x2x1
jax: 0.10.0
libtpu: 0.0.40
codegen_flags: <defaults>
</compile_context>

<pallas_src>
import jax
import jax.numpy as jnp
from jax.experimental import pallas as pl
from jax.experimental.pallas import tpu as pltpu


def yolo_head_kernel(patches_ref, w1_ref, w2_ref, b2_ref, o_ref):
    # patches_ref: (tile_m, 9*C_in+1)    im2col rows + trailing ones column
    # w1_ref:      (9*C_in+1, C_mid)     BN-scale-folded 3x3 weights; last row
    #                                    is the folded BN bias (hit by the ones
    #                                    column in patches)
    # w2_ref:      (C_mid, C_out_pad)    1x1 conv weights (zero-padded lanes)
    # b2_ref:      (1, C_out_pad)        1x1 conv bias    (zero-padded lanes)
    # o_ref:       (tile_m, C_out_pad)
    h = jnp.dot(patches_ref[...], w1_ref[...],
                preferred_element_type=jnp.float32)

    # LeakyReLU(negative_slope=0.01); BN already folded into the matmul above.
    h = jnp.where(h > 0, h, 0.01 * h)

    # 1x1 conv (single matmul) + bias.
    out = jnp.dot(h, w2_ref[...], preferred_element_type=jnp.float32)
    out = out + b2_ref[...]

    o_ref[...] = out.astype(o_ref.dtype)


def _tensorcores_per_chip():
    """v7x exposes 2 TensorCores per chip; v5e/v6e are single-TC."""
    try:
        kind = jax.devices()[0].device_kind.lower()
    except Exception:
        return 1
    return 2 if "v7" in kind else 1


def yolo_head_forward(x_nchw, w1, gamma, beta, run_mean, run_var, w2, b2,
                      eps=1e-5):
    """x_nchw: (N, C_in, H, W) float32. Weights in PyTorch layouts:
       w1: (C_mid, C_in, 3, 3), w2: (C_out, C_mid, 1, 1), b2: (C_out,)."""
    N, C_in, H, W = x_nchw.shape
    C_mid = w1.shape[0]
    C_out = w2.shape[0]
    C_out_pad = ((C_out + 127) // 128) * 128          # lane-dense output
    M = N * H * W
    K = 9 * C_in
    K1 = K + 1                                        # + ones column (BN bias)

    # ---- Glue (plain JAX): layout conversion, halo pad, im2col, BN fold ----
    x_nhwc = jnp.transpose(x_nchw, (0, 2, 3, 1))                  # (N,H,W,Cin)
    x_pad = jnp.pad(x_nhwc, ((0, 0), (1, 1), (1, 1), (0, 0)))     # (N,H+2,W+2,Cin)
    # im2col: concatenate the 9 shifted slabs along the channel axis, then a
    # ones column that carries the folded BN bias through the first matmul.
    slabs = [x_pad[:, dy:dy + H, dx:dx + W, :]
             for dy in range(3) for dx in range(3)]
    patches = jnp.concatenate(slabs, axis=-1).reshape(M, K)       # (M, 9*Cin)
    patches = jnp.concatenate(
        [patches, jnp.ones((M, 1), patches.dtype)], axis=-1)      # (M, K1)

    # Fold eval-mode BatchNorm into the 3x3 weights (scale) and an extra
    # bias row (hit by the ones column above).
    inv_std = 1.0 / jnp.sqrt(run_var + eps)
    scale = gamma * inv_std                                       # (C_mid,)
    bn_bias = beta - run_mean * scale                             # (C_mid,)

    # (Cmid,Cin,3,3) -> (3,3,Cin,Cmid) -> (9*Cin, Cmid): rows tap-major,
    # channel-fastest — matches the patches concatenation order above.
    w1_mat = jnp.transpose(w1, (2, 3, 1, 0)).reshape(K, C_mid)
    w1_mat = w1_mat * scale[None, :]
    w1_mat = jnp.concatenate([w1_mat, bn_bias[None, :]], axis=0)  # (K1, Cmid)

    # 1x1 conv weights/bias, zero-padded on the output-channel (lane) axis.
    w2_mat = w2.reshape(C_out, C_mid).T                           # (Cmid, Cout)
    w2_mat = jnp.pad(w2_mat, ((0, 0), (0, C_out_pad - C_out)))    # (Cmid, Cout_pad)
    b2_row = jnp.pad(b2.reshape(1, C_out), ((0, 0), (0, C_out_pad - C_out)))

    # ---- Grid: single step on single-TC parts (v5e/v6e) so no per-step
    #      overhead is paid; 2-way "parallel" split only on v7x so the second
    #      TensorCore gets work. Weights stay resident across the grid. ----
    if _tensorcores_per_chip() >= 2 and M % 2 == 0 and (M // 2) % 8 == 0:
        tile_m = M // 2
        grid_m = 2
        dim_sem = ("parallel",)
    else:
        tile_m = M
        grid_m = 1
        dim_sem = ("arbitrary",)

    # Explicit scoped-VMEM ceiling: safe on every generation (v5e 128 MiB,
    # v6e 128 MiB, v7x 64 MiB physical per core) and far above what these
    # tiny double-buffered blocks need.
    vmem_limit_bytes = 32 << 20

    out_flat = pl.pallas_call(
        yolo_head_kernel,
        out_shape=jax.ShapeDtypeStruct((M, C_out_pad), jnp.float32),
        grid_spec=pltpu.PrefetchScalarGridSpec(
            num_scalar_prefetch=0,
            grid=(grid_m,),
            in_specs=[
                pl.BlockSpec((tile_m, K1), lambda m: (m, 0)),
                pl.BlockSpec((K1, C_mid), lambda m: (0, 0)),
                pl.BlockSpec((C_mid, C_out_pad), lambda m: (0, 0)),
                pl.BlockSpec((1, C_out_pad), lambda m: (0, 0)),
            ],
            out_specs=pl.BlockSpec((tile_m, C_out_pad), lambda m: (m, 0)),
        ),
        compiler_params=pltpu.CompilerParams(
            dimension_semantics=dim_sem,
            vmem_limit_bytes=vmem_limit_bytes),
    )(patches, w1_mat, w2_mat, b2_row)

    # Strip the lane padding and return in PyTorch NCHW convention.
    out_nhwc = out_flat.reshape(N, H, W, C_out_pad)[..., :C_out]
    return jnp.transpose(out_nhwc, (0, 3, 1, 2))


def reference_forward(x_nchw, w1, gamma, beta, run_mean, run_var, w2, b2,
                      eps=1e-5):
    """Pure-JAX reference (lax conv, HIGHEST precision) for correctness check."""
    y = jax.lax.conv_general_dilated(
        x_nchw, w1, window_strides=(1, 1), padding=((1, 1), (1, 1)),
        dimension_numbers=("NCHW", "OIHW", "NCHW"),
        precision=jax.lax.Precision.HIGHEST)
    sc = (gamma / jnp.sqrt(run_var + eps))[None, :, None, None]
    bi = (beta - run_mean * gamma / jnp.sqrt(run_var + eps))[None, :, None, None]
    y = y * sc + bi
    y = jnp.where(y > 0, y, 0.01 * y)
    y = jax.lax.conv_general_dilated(
        y, w2, window_strides=(1, 1), padding=((0, 0), (0, 0)),
        dimension_numbers=("NCHW", "OIHW", "NCHW"),
        precision=jax.lax.Precision.HIGHEST)
    return y + b2[None, :, None, None]


if __name__ == "__main__":
    # Small shapes consistent with YOLOHead(channels=[32, 18], in_channels=4).
    N, C_in, H, W = 2, 4, 16, 16
    C_mid, C_out = 32, 18

    key = jax.random.PRNGKey(0)
    ks = jax.random.split(key, 8)
    x = jax.random.normal(ks[0], (N, C_in, H, W), jnp.float32)
    w1 = jax.random.normal(ks[1], (C_mid, C_in, 3, 3), jnp.float32) * 0.1
    gamma = jax.random.normal(ks[2], (C_mid,), jnp.float32) * 0.1 + 1.0
    beta = jax.random.normal(ks[3], (C_mid,), jnp.float32) * 0.1
    run_mean = jax.random.normal(ks[4], (C_mid,), jnp.float32) * 0.1
    run_var = jax.random.uniform(ks[5], (C_mid,), jnp.float32, 0.5, 1.5)
    w2 = jax.random.normal(ks[6], (C_out, C_mid, 1, 1), jnp.float32) * 0.1
    b2 = jax.random.normal(ks[7], (C_out,), jnp.float32) * 0.1

    out = yolo_head_forward(x, w1, gamma, beta, run_mean, run_var, w2, b2)
    out = jax.block_until_ready(out)

    ref = reference_forward(x, w1, gamma, beta, run_mean, run_var, w2, b2)
    assert out.shape == (N, C_out, H, W)
    # Kernel matmuls run at default MXU precision (single bf16 pass) vs the
    # f32-emulated reference -> compare at ~bf16-accumulation tolerance.
    assert jnp.allclose(out, ref, rtol=2e-2, atol=2e-2), "mismatch vs reference"

    print("KERNEL_OK")
</pallas_src>

<mosaic_0001>
module attributes {stable_mosaic.version = 11 : i64} {
  func.func @yolo_head_kernel(%arg0: i32, %arg1: memref<512x37xf32, #tpu.memory_space<vmem>>, %arg2: memref<37x32xf32, #tpu.memory_space<vmem>>, %arg3: memref<32x128xf32, #tpu.memory_space<vmem>>, %arg4: memref<1x128xf32, #tpu.memory_space<vmem>>, %arg5: memref<512x128xf32, #tpu.memory_space<vmem>>) attributes {dimension_semantics = [#tpu.dimension_semantics<arbitrary>], iteration_bounds = array<i64: 1>, scalar_prefetch = 0 : i64, scratch_operands = 0 : i64, tpu.core_type = #tpu.core_type<tc>, window_params = [{transform_indices = @transform_0, window_bounds = array<i64: 512, 37>}, {pipeline_mode = #tpu.pipeline_mode<synchronous>, transform_indices = @transform_1, window_bounds = array<i64: 37, 32>}, {pipeline_mode = #tpu.pipeline_mode<synchronous>, transform_indices = @transform_2, window_bounds = array<i64: 32, 128>}, {pipeline_mode = #tpu.pipeline_mode<synchronous>, transform_indices = @transform_3, window_bounds = array<i64: 1, 128>}, {transform_indices = @transform_4, window_bounds = array<i64: 512, 128>}]} {
    %c0 = arith.constant 0 : index
    %c0_0 = arith.constant 0 : index
    %0 = vector.load %arg1[%c0, %c0_0] : memref<512x37xf32, #tpu.memory_space<vmem>>, vector<512x37xf32>
    %c0_1 = arith.constant 0 : index
    %c0_2 = arith.constant 0 : index
    %1 = vector.load %arg2[%c0_1, %c0_2] : memref<37x32xf32, #tpu.memory_space<vmem>>, vector<37x32xf32>
    %cst = arith.constant dense<0.000000e+00> : vector<512x32xf32>
    %2 = tpu.matmul %0, %1, %cst {dimension_numbers = #tpu.dot_dimension_numbers<[1], [0], [0], [1], [0, 0, 1, 1], [], []>} : vector<512x37xf32>, vector<37x32xf32>, vector<512x32xf32> -> vector<512x32xf32>
    %cst_3 = arith.constant 0.000000e+00 : f32
    %3 = vector.broadcast %cst_3 : f32 to vector<512x32xf32>
    %4 = arith.cmpf ogt, %2, %3 : vector<512x32xf32>
    %cst_4 = arith.constant 0.00999999977 : f32
    %5 = vector.broadcast %cst_4 : f32 to vector<512x32xf32>
    %6 = arith.mulf %5, %2 : vector<512x32xf32>
    %7 = arith.select %4, %2, %6 : vector<512x32xi1>, vector<512x32xf32>
    %c0_5 = arith.constant 0 : index
    %c0_6 = arith.constant 0 : index
    %8 = vector.load %arg3[%c0_5, %c0_6] : memref<32x128xf32, #tpu.memory_space<vmem>>, vector<32x128xf32>
    %cst_7 = arith.constant dense<0.000000e+00> : vector<512x128xf32>
    %9 = tpu.matmul %7, %8, %cst_7 {dimension_numbers = #tpu.dot_dimension_numbers<[1], [0], [0], [1], [0, 0, 1, 1], [], []>} : vector<512x32xf32>, vector<32x128xf32>, vector<512x128xf32> -> vector<512x128xf32>
    %c0_8 = arith.constant 0 : index
    %c0_9 = arith.constant 0 : index
    %10 = vector.load %arg4[%c0_8, %c0_9] : memref<1x128xf32, #tpu.memory_space<vmem>>, vector<1x128xf32>
    %11 = vector.broadcast %10 : vector<1x128xf32> to vector<512x128xf32>
    %12 = arith.addf %9, %11 : vector<512x128xf32>
    %c0_10 = arith.constant 0 : index
    %c0_11 = arith.constant 0 : index
    %13 = vector.load %arg5[%c0_10, %c0_11] : memref<512x128xf32, #tpu.memory_space<vmem>>, vector<512x128xf32>
    tpu.vector_store %arg5[%c0_10, %c0_11], %12 {strides = array<i32>} : memref<512x128xf32, #tpu.memory_space<vmem>>, vector<512x128xf32>,
    return
  }
  func.func @transform_0(%arg0: i32) -> (i32, i32) {
    %c0_i32 = arith.constant 0 : i32
    %c0_i32_0 = arith.constant 0 : i32
    return %arg0, %c0_i32 : i32, i32
  }
  func.func @transform_1(%arg0: i32) -> (i32, i32) {
    %c0_i32 = arith.constant 0 : i32
    %c0_i32_0 = arith.constant 0 : i32
    %c0_i32_1 = arith.constant 0 : i32
    return %c0_i32, %c0_i32_0 : i32, i32
  }
  func.func @transform_2(%arg0: i32) -> (i32, i32) {
    %c0_i32 = arith.constant 0 : i32
    %c0_i32_0 = arith.constant 0 : i32
    %c0_i32_1 = arith.constant 0 : i32
    return %c0_i32, %c0_i32_0 : i32, i32
  }
  func.func @transform_3(%arg0: i32) -> (i32, i32) {
    %c0_i32 = arith.constant 0 : i32
    %c0_i32_0 = arith.constant 0 : i32
    %c0_i32_1 = arith.constant 0 : i32
    return %c0_i32, %c0_i32_0 : i32, i32
  }
  func.func @transform_4(%arg0: i32) -> (i32, i32) {
    %c0_i32 = arith.constant 0 : i32
    %c0_i32_0 = arith.constant 0 : i32
    return %arg0, %c0_i32 : i32, i32
  }
}

</mosaic_0001>

<bundles_post_ra>
// kernel: tpu_custom_call.1
= control target key start
LH: loop header
LB: loop body
LE: loop exit
PB: predicated region body
PF: predicated region fallthrough
CT: control target
= control target key end

     0   :  { %vm280_vm0 = vcmask 1044480   ;;  %vm87_vm1 = vcmask 302080   ;;  %s2479_s0 = inlined_call_operand.vmem [shape: f32[512,37], index: 0, kind: input, shape index: {}]   ;;  %s2480_s1 = inlined_call_operand.vmem [shape: f32[37,32], index: 1, kind: input, shape index: {}]   ;;  %s2481_s2 = inlined_call_operand.vmem [shape: f32[32,128], index: 2, kind: input, shape index: {}]   ;;  %s2482_s3 = inlined_call_operand.vmem [shape: f32[1,128], index: 3, kind: input, shape index: {}]   ;;  %s2483_s4 = inlined_call_operand.hbm [shape: f32[512,128], index: 4, kind: output, shape index: {}]  }
   0x1   :  { %v86_v0 = vld [vmem:[%s2480_s1 + $0x20] sm:$0x1f]  ;;  %v85_v1 = vld [vmem:[%s2480_s1 + $0x18] sm:$0xff]  ;;  %v84_v3 = vld [vmem:[%s2480_s1 + $0x10] sm:$0xff] }
   0x2   :  { %1797 = vmatprep.subr.msk.mxu0 %vm280_vm0, %v86_v0  ;;  %v18_v2 = vld [vmem:[%s2479_s0] sm:$0xff]  ;;  %v83_v4 = vld [vmem:[%s2480_s1 + $0x8] sm:$0xff]  ;;  %v20_v7 = vld [vmem:[%s2479_s0 + $0x10] sm:$0xff] }
   0x3   :  { %1798 = vmatpush3.msk.msra.mxu0 %vm280_vm0, %v86_v0  ;;  %1807 = vmatprep.mubr.msk.f32.mxu0 %vm87_vm1, %v18_v2  ;;  %v82_v5 = vld [vmem:[%s2480_s1] sm:$0xff]  ;;  %v19_v6 = vld [vmem:[%s2479_s0 + $0x8] sm:$0xff]  ;;  %v21_v8 = vld [vmem:[%s2479_s0 + $0x18] sm:$0xff] }
   0x4   :  { %1799 = vmatprep.subr.mxu0 %v85_v1  ;;  %v22_v9 = vld [vmem:[%s2479_s0 + $0x20] sm:$0xff]  ;;  %v23_v10 = vld [vmem:[%s2479_s0 + $0x28] sm:$0xff]  ;;  %v24_v11 = vld [vmem:[%s2479_s0 + $0x30] sm:$0xff] }
   0x5   :  { %1800 = vmatpush3.msra.mxu0 %v85_v1  ;;  %v25_v12 = vld [vmem:[%s2479_s0 + $0x38] sm:$0xff]  ;;  %v26_v13 = vld [vmem:[%s2479_s0 + $0x40] sm:$0xff] }
   0x6   :  { %1801 = vmatprep.subr.mxu0 %v84_v3  ;;  %v864_v14 = vld [vmem:[%s2481_s2 + $0x18] sm:$0xff] }
   0x7   :  { %1802 = vmatpush3.msra.mxu0 %v84_v3 }
   0x8   :  { %1803 = vmatprep.subr.mxu0 %v83_v4 }
   0x9   :  { %1804 = vmatpush3.msra.mxu0 %v83_v4 }
   0xa   :  { %1805 = vmatprep.subr.mxu0 %v82_v5 }
   0xb   :  { %1806 = vmatpush3.msra.mxu0 %v82_v5 }
   0xc   :  { %1808 = vmatmul.mubr.msk.f32.vlgmr.msra.gmra.mxu0 %vm87_vm1, %v19_v6 }
   0xd   :  { %1810 = vmatprep.mubr.msk.f32.mxu0 %vm87_vm1, %v20_v7 }
  0x10   :  { %1811 = vmatmul.mubr.msk.f32.gmra.mxu0 %vm87_vm1, %v21_v8 }
  0x11   :  { %1813 = vmatprep.mubr.msk.f32.mxu0 %vm87_vm1, %v22_v9 }
  0x14   :  { %1814 = vmatmul.mubr.msk.f32.gmra.mxu0 %vm87_vm1, %v23_v10 }
  0x15   :  { %1816 = vmatprep.mubr.msk.f32.mxu0 %vm87_vm1, %v24_v11 }
  0x18   :  { %1817 = vmatmul.mubr.msk.f32.gmra.mxu0 %vm87_vm1, %v25_v12 }
  0x19   :  { %9 = vsyncpa [#allocation3], 0  ;;  %1819 = vmatprep.mubr.msk.f32.mxu0 %vm87_vm1, %v26_v13  ;;  %v27_v15 = vld [vmem:[%s2479_s0 + $0x48] sm:$0xff]  ;;  %1903 = vmatprep.subr.mxu1 %v864_v14  ;;  %v28_v16 = vld [vmem:[%s2479_s0 + $0x50] sm:$0xff]  ;;  %vm872_vm4 = vcmask 261120  }
  0x1a   :  { %1904 = vmatpush3.msra.mxu1 %v864_v14  ;;  %v29_v17 = vld [vmem:[%s2479_s0 + $0x58] sm:$0xff]  ;;  %v30_v18 = vld [vmem:[%s2479_s0 + $0x60] sm:$0xff]  ;;  %v31_v19 = vld [vmem:[%s2479_s0 + $0x68] sm:$0xff] }
  0x1b   :  { %v32_v20 = vld [vmem:[%s2479_s0 + $0x70] sm:$0xff]  ;;  %v33_v21 = vld [vmem:[%s2479_s0 + $0x78] sm:$0xff]  ;;  %v34_v22 = vld [vmem:[%s2479_s0 + $0x80] sm:$0xff] }
  0x1c   :  { %1820 = vmatmul.mubr.msk.f32.gmra.mxu0 %vm87_vm1, %v27_v15  ;;  %v35_v23 = vld [vmem:[%s2479_s0 + $0x88] sm:$0xff]  ;;  %v36_v24 = vld [vmem:[%s2479_s0 + $0x90] sm:$0xff]  ;;  %v37_v25 = vld [vmem:[%s2479_s0 + $0x98] sm:$0xff] }
  0x1d   :  { %1822 = vmatprep.mubr.msk.f32.mxu0 %vm87_vm1, %v28_v16  ;;  %v38_v26 = vld [vmem:[%s2479_s0 + $0xa0] sm:$0xff]  ;;  %v39_v27 = vld [vmem:[%s2479_s0 + $0xa8] sm:$0xff]  ;;  %v40_v28 = vld [vmem:[%s2479_s0 + $0xb0] sm:$0xff] }
  0x1e   :  { %v41_v29 = vld [vmem:[%s2479_s0 + $0xb8] sm:$0xff]  ;;  %v42_v30 = vld [vmem:[%s2479_s0 + $0xc0] sm:$0xff]  ;;  %v43_v31 = vld [vmem:[%s2479_s0 + $0xc8] sm:$0xff] }
  0x1f   :  { %v44_v32 = vld [vmem:[%s2479_s0 + $0xd0] sm:$0xff]  ;;  %v45_v33 = vld [vmem:[%s2479_s0 + $0xd8] sm:$0xff]  ;;  %v46_v34 = vld [vmem:[%s2479_s0 + $0xe0] sm:$0xff] }
  0x20   :  { %1823 = vmatmul.mubr.msk.f32.gmra.mxu0 %vm87_vm1, %v29_v17  ;;  %v47_v35 = vld [vmem:[%s2479_s0 + $0xe8] sm:$0xff]  ;;  %v48_v36 = vld [vmem:[%s2479_s0 + $0xf0] sm:$0xff]  ;;  %v49_v37 = vld [vmem:[%s2479_s0 + $0xf8] sm:$0xff] }
  0x21   :  { %1825 = vmatprep.mubr.msk.f32.mxu0 %vm87_vm1, %v30_v18  ;;  %v50_v38 = vld [vmem:[%s2479_s0 + $0x100] sm:$0xff]  ;;  %v51_v39 = vld [vmem:[%s2479_s0 + $0x108] sm:$0xff]  ;;  %v52_v40 = vld [vmem:[%s2479_s0 + $0x110] sm:$0xff] }
  0x22   :  { %v863_v41 = vld [vmem:[%s2481_s2 + $0x10] sm:$0xff]  ;;  %v53_v42 = vld [vmem:[%s2479_s0 + $0x118] sm:$0xff]  ;;  %v54_v43 = vld [vmem:[%s2479_s0 + $0x120] sm:$0xff] }
  0x23   :  { %1905 = vmatprep.subr.mxu1 %v863_v41  ;;  %v862_v44 = vld [vmem:[%s2481_s2 + $0x8] sm:$0xff]  ;;  %v861_v45 = vld [vmem:[%s2481_s2] sm:$0xff]  ;;  %v56_v47 = vld [vmem:[%s2479_s0 + $0x130] sm:$0xff] }
  0x24   :  { %1826 = vmatmul.mubr.msk.f32.gmra.mxu0 %vm87_vm1, %v31_v19  ;;  %1906 = vmatpush3.msra.mxu1 %v863_v41  ;;  %v55_v46 = vld [vmem:[%s2479_s0 + $0x128] sm:$0xff]  ;;  %v57_v48 = vld [vmem:[%s2479_s0 + $0x138] sm:$0xff]  ;;  %v58_v49 = vld [vmem:[%s2479_s0 + $0x140] sm:$0xff] }
  0x25   :  { %1828 = vmatprep.mubr.msk.f32.mxu0 %vm87_vm1, %v32_v20  ;;  %1907 = vmatprep.subr.mxu1 %v862_v44  ;;  %v59_v50 = vld [vmem:[%s2479_s0 + $0x148] sm:$0xff]  ;;  %v60_v51 = vld [vmem:[%s2479_s0 + $0x150] sm:$0xff]  ;;  %v61_v52 = vld [vmem:[%s2479_s0 + $0x158] sm:$0xff] }
  0x26   :  { %1908 = vmatpush3.msra.mxu1 %v862_v44  ;;  %v62_v53 = vld [vmem:[%s2479_s0 + $0x160] sm:$0xff]  ;;  %v63_v54 = vld [vmem:[%s2479_s0 + $0x168] sm:$0xff]  ;;  %v64_v55 = vld [vmem:[%s2479_s0 + $0x170] sm:$0xff] }
  0x27   :  { %1909 = vmatprep.subr.mxu1 %v861_v45  ;;  %v65_v56 = vld [vmem:[%s2479_s0 + $0x178] sm:$0xff]  ;;  %v66_v57 = vld [vmem:[%s2479_s0 + $0x180] sm:$0xff]  ;;  %v67_v58 = vld [vmem:[%s2479_s0 + $0x188] sm:$0xff] }
  0x28   :  { %1829 = vmatmul.mubr.msk.f32.gmra.mxu0 %vm87_vm1, %v33_v21  ;;  %1910 = vmatpush3.msra.mxu1 %v861_v45  ;;  %v68_v59 = vld [vmem:[%s2479_s0 + $0x190] sm:$0xff]  ;;  %v69_v60 = vld [vmem:[%s2479_s0 + $0x198] sm:$0xff]  ;;  %v70_v61 = vld [vmem:[%s2479_s0 + $0x1a0] sm:$0xff] }
  0x29   :  { %1831 = vmatprep.mubr.msk.f32.mxu0 %vm87_vm1, %v34_v22  ;;  %v71_v62 = vld [vmem:[%s2479_s0 + $0x1a8] sm:$0xff]  ;;  %v72_v63 = vld [vmem:[%s2479_s0 + $0x1b0] sm:$0xff]  ;;  %v73_v0 = vld [vmem:[%s2479_s0 + $0x1b8] sm:$0xff] }
  0x2a   :  { %v74_v1 = vld [vmem:[%s2479_s0 + $0x1c0] sm:$0xff]  ;;  %v75_v2 = vld [vmem:[%s2479_s0 + $0x1c8] sm:$0xff]  ;;  %v76_v3 = vld [vmem:[%s2479_s0 + $0x1d0] sm:$0xff] }
  0x2b   :  { %v77_v4 = vld [vmem:[%s2479_s0 + $0x1d8] sm:$0xff]  ;;  %v78_v5 = vld [vmem:[%s2479_s0 + $0x1e0] sm:$0xff]  ;;  %v79_v6 = vld [vmem:[%s2479_s0 + $0x1e8] sm:$0xff] }
  0x2c   :  { %1832 = vmatmul.mubr.msk.f32.gmra.mxu0 %vm87_vm1, %v35_v23  ;;  %v80_v7 = vld [vmem:[%s2479_s0 + $0x1f0] sm:$0xff]  ;;  %v81_v8 = vld [vmem:[%s2479_s0 + $0x1f8] sm:$0xff] }
  0x2d   :  { %1834 = vmatprep.mubr.msk.f32.mxu0 %vm87_vm1, %v36_v24 }
  0x30   :  { %1835 = vmatmul.mubr.msk.f32.gmra.mxu0 %vm87_vm1, %v37_v25 }
  0x31   :  { %1837 = vmatprep.mubr.msk.f32.mxu0 %vm87_vm1, %v38_v26 }
  0x34   :  { %1838 = vmatmul.mubr.msk.f32.gmra.mxu0 %vm87_vm1, %v39_v27 }
  0x35   :  { %1840 = vmatprep.mubr.msk.f32.mxu0 %vm87_vm1, %v40_v28 }
  0x38   :  { %1841 = vmatmul.mubr.msk.f32.gmra.mxu0 %vm87_vm1, %v41_v29 }
  0x39   :  { %1843 = vmatprep.mubr.msk.f32.mxu0 %vm87_vm1, %v42_v30 }
  0x3c   :  { %1844 = vmatmul.mubr.msk.f32.gmra.mxu0 %vm87_vm1, %v43_v31 }
  0x3d   :  { %1846 = vmatprep.mubr.msk.f32.mxu0 %vm87_vm1, %v44_v32 }
  0x40   :  { %1847 = vmatmul.mubr.msk.f32.gmra.mxu0 %vm87_vm1, %v45_v33 }
  0x41   :  { %1849 = vmatprep.mubr.msk.f32.mxu0 %vm87_vm1, %v46_v34 }
  0x44   :  { %1850 = vmatmul.mubr.msk.f32.gmra.mxu0 %vm87_vm1, %v47_v35 }
  0x45   :  { %1852 = vmatprep.mubr.msk.f32.mxu0 %vm87_vm1, %v48_v36 }
  0x48   :  { %1853 = vmatmul.mubr.msk.f32.gmra.mxu0 %vm87_vm1, %v49_v37 }
  0x49   :  { %1855 = vmatprep.mubr.msk.f32.mxu0 %vm87_vm1, %v50_v38 }
  0x4c   :  { %1856 = vmatmul.mubr.msk.f32.gmra.mxu0 %vm87_vm1, %v51_v39 }
  0x4d   :  { %1858 = vmatprep.mubr.msk.f32.mxu0 %vm87_vm1, %v52_v40 }
  0x50   :  { %1859 = vmatmul.mubr.msk.f32.gmra.mxu0 %vm87_vm1, %v53_v42 }
  0x51   :  { %1861 = vmatprep.mubr.msk.f32.mxu0 %vm87_vm1, %v54_v43 }
  0x54   :  { %1862 = vmatmul.mubr.msk.f32.gmra.mxu0 %vm87_vm1, %v55_v46 }
  0x55   :  { %1864 = vmatprep.mubr.msk.f32.mxu0 %vm87_vm1, %v56_v47 }
  0x58   :  { %1865 = vmatmul.mubr.msk.f32.gmra.mxu0 %vm87_vm1, %v57_v48 }
  0x59   :  { %1867 = vmatprep.mubr.msk.f32.mxu0 %vm87_vm1, %v58_v49 }
  0x5c   :  { %1868 = vmatmul.mubr.msk.f32.gmra.mxu0 %vm87_vm1, %v59_v50 }
  0x5d   :  { %1870 = vmatprep.mubr.msk.f32.mxu0 %vm87_vm1, %v60_v51 }
  0x60   :  { %1871 = vmatmul.mubr.msk.f32.gmra.mxu0 %vm87_vm1, %v61_v52 }
  0x61   :  { %1873 = vmatprep.mubr.msk.f32.mxu0 %vm87_vm1, %v62_v53 }
  0x64   :  { %1874 = vmatmul.mubr.msk.f32.gmra.mxu0 %vm87_vm1, %v63_v54 }
  0x65   :  { %1876 = vmatprep.mubr.msk.f32.mxu0 %vm87_vm1, %v64_v55 }
  0x68   :  { %1877 = vmatmul.mubr.msk.f32.gmra.mxu0 %vm87_vm1, %v65_v56 }
  0x69   :  { %1879 = vmatprep.mubr.msk.f32.mxu0 %vm87_vm1, %v66_v57 }
  0x6c   :  { %1880 = vmatmul.mubr.msk.f32.gmra.mxu0 %vm87_vm1, %v67_v58 }
  0x6d   :  { %1882 = vmatprep.mubr.msk.f32.mxu0 %vm87_vm1, %v68_v59 }
  0x70   :  { %1883 = vmatmul.mubr.msk.f32.gmra.mxu0 %vm87_vm1, %v69_v60 }
  0x71   :  { %1885 = vmatprep.mubr.msk.f32.mxu0 %vm87_vm1, %v70_v61 }
  0x74   :  { %1886 = vmatmul.mubr.msk.f32.gmra.mxu0 %vm87_vm1, %v71_v62 }
  0x75   :  { %1888 = vmatprep.mubr.msk.f32.mxu0 %vm87_vm1, %v72_v63 }
  0x78   :  { %1889 = vmatmul.mubr.msk.f32.gmra.mxu0 %vm87_vm1, %v73_v0 }
  0x79   :  { %1891 = vmatprep.mubr.msk.f32.mxu0 %vm87_vm1, %v74_v1 }
  0x7c   :  { %1892 = vmatmul.mubr.msk.f32.gmra.mxu0 %vm87_vm1, %v75_v2 }
  0x7d   :  { %1894 = vmatprep.mubr.msk.f32.mxu0 %vm87_vm1, %v76_v3 }
  0x80   :  { %1895 = vmatmul.mubr.msk.f32.gmra.mxu0 %vm87_vm1, %v77_v4 }
  0x81   :  { %1897 = vmatprep.mubr.msk.f32.mxu0 %vm87_vm1, %v78_v5 }
  0x84   :  { %1898 = vmatmul.mubr.msk.f32.gmra.mxu0 %vm87_vm1, %v79_v6 }
  0x85   :  { %1900 = vmatprep.mubr.msk.f32.mxu0 %vm87_vm1, %v80_v7 }
  0x88   :  { %1901 = vmatmul.mubr.msk.f32.gmra.mxu0 %vm87_vm1, %v81_v8 }
  0xcc   :  { %v1809_v9 = vpop.f32.mrf.mxu0 }
  0xcd   :  { %v734_v10 = vmul.f32 0.01, %v1809_v9  ;;  %vm670_vm2 = vcmp.gt.f32.partialorder %v1809_v9, 0.0 }
  0xce   :  { %v350_v11 = vpop.f32.mrf.mxu0 }
  0xcf   :  { %v733_v12 = vmul.f32 0.01, %v350_v11  ;;  %vm669_vm3 = vcmp.gt.f32.partialorder %v350_v11, 0.0  ;;  %v798_v17 = vsel %vm670_vm2, %v1809_v9, %v734_v10 }
  0xd0   :  { %v1812_v13 = vpop.f32.mrf.mxu0 }
  0xd1   :  { %v797_v14 = vsel %vm669_vm3, %v350_v11, %v733_v12  ;;  %v736_v15 = vmul.f32 0.01, %v1812_v13  ;;  %vm672_vm5 = vcmp.gt.f32.partialorder %v1812_v13, 0.0 }
  0xd2   :  { %v360_v16 = vpop.f32.mrf.mxu0  ;;  %1911 = vmatprep.mubr.msk.f32.mxu1 %vm872_vm4, %v797_v14 }
  0xd3   :  { %vm671_vm6 = vcmp.gt.f32.partialorder %v360_v16, 0.0  ;;  %v735_v18 = vmul.f32 0.01, %v360_v16  ;;  %1912 = vmatmul.mubr.msk.f32.vlgmr.msra.gmra.mxu1 %vm872_vm4, %v798_v17  ;;  %v800_v23 = vsel %vm672_vm5, %v1812_v13, %v736_v15 }
  0xd4   :  { %v1815_v19 = vpop.f32.mrf.mxu0 }
  0xd5   :  { %v799_v20 = vsel %vm671_vm6, %v360_v16, %v735_v18  ;;  %v738_v21 = vmul.f32 0.01, %v1815_v19  ;;  %vm674_vm7 = vcmp.gt.f32.partialorder %v1815_v19, 0.0 }
  0xd6   :  { %v370_v22 = vpop.f32.mrf.mxu0  ;;  %1914 = vmatprep.mubr.msk.f32.mxu1 %vm872_vm4, %v799_v20 }
  0xd7   :  { %vm673_vm8 = vcmp.gt.f32.partialorder %v370_v22, 0.0  ;;  %v737_v24 = vmul.f32 0.01, %v370_v22  ;;  %1915 = vmatmul.mubr.msk.f32.gmra.mxu1 %vm872_vm4, %v800_v23  ;;  %v802_v29 = vsel %vm674_vm7, %v1815_v19, %v738_v21 }
  0xd8   :  { %v1818_v25 = vpop.f32.mrf.mxu0 }
  0xd9   :  { %v801_v26 = vsel %vm673_vm8, %v370_v22, %v737_v24  ;;  %v740_v27 = vmul.f32 0.01, %v1818_v25  ;;  %vm676_vm9 = vcmp.gt.f32.partialorder %v1818_v25, 0.0 }
  0xda   :  { %v380_v28 = vpop.f32.mrf.mxu0  ;;  %1917 = vmatprep.mubr.msk.f32.mxu1 %vm872_vm4, %v801_v26 }
  0xdb   :  { %vm675_vm10 = vcmp.gt.f32.partialorder %v380_v28, 0.0  ;;  %v739_v30 = vmul.f32 0.01, %v380_v28  ;;  %1918 = vmatmul.mubr.msk.f32.gmra.mxu1 %vm872_vm4, %v802_v29  ;;  %v804_v35 = vsel %vm676_vm9, %v1818_v25, %v740_v27 }
  0xdc   :  { %v1821_v31 = vpop.f32.mrf.mxu0 }
  0xdd   :  { %v803_v32 = vsel %vm675_vm10, %v380_v28, %v739_v30  ;;  %v742_v33 = vmul.f32 0.01, %v1821_v31  ;;  %vm678_vm11 = vcmp.gt.f32.partialorder %v1821_v31, 0.0 }
  0xde   :  { %v390_v34 = vpop.f32.mrf.mxu0  ;;  %1920 = vmatprep.mubr.msk.f32.mxu1 %vm872_vm4, %v803_v32 }
  0xdf   :  { %vm677_vm12 = vcmp.gt.f32.partialorder %v390_v34, 0.0  ;;  %v741_v36 = vmul.f32 0.01, %v390_v34  ;;  %1921 = vmatmul.mubr.msk.f32.gmra.mxu1 %vm872_vm4, %v804_v35  ;;  %v806_v41 = vsel %vm678_vm11, %v1821_v31, %v742_v33 }
  0xe0   :  { %v1824_v37 = vpop.f32.mrf.mxu0 }
  0xe1   :  { %v805_v38 = vsel %vm677_vm12, %v390_v34, %v741_v36  ;;  %v744_v39 = vmul.f32 0.01, %v1824_v37  ;;  %vm680_vm13 = vcmp.gt.f32.partialorder %v1824_v37, 0.0 }
  0xe2   :  { %v400_v40 = vpop.f32.mrf.mxu0  ;;  %1923 = vmatprep.mubr.msk.f32.mxu1 %vm872_vm4, %v805_v38 }
  0xe3   :  { %vm679_vm14 = vcmp.gt.f32.partialorder %v400_v40, 0.0  ;;  %v743_v42 = vmul.f32 0.01, %v400_v40  ;;  %1924 = vmatmul.mubr.msk.f32.gmra.mxu1 %vm872_vm4, %v806_v41  ;;  %v808_v47 = vsel %vm680_vm13, %v1824_v37, %v744_v39 }
  0xe4   :  { %v1827_v43 = vpop.f32.mrf.mxu0 }
  0xe5   :  { %v807_v44 = vsel %vm679_vm14, %v400_v40, %v743_v42  ;;  %v746_v45 = vmul.f32 0.01, %v1827_v43  ;;  %vm682_vm15 = vcmp.gt.f32.partialorder %v1827_v43, 0.0 }
  0xe6   :  { %v410_v46 = vpop.f32.mrf.mxu0  ;;  %1926 = vmatprep.mubr.msk.f32.mxu1 %vm872_vm4, %v807_v44 }
  0xe7   :  { %vm681_vm0 = vcmp.gt.f32.partialorder %v410_v46, 0.0  ;;  %v745_v48 = vmul.f32 0.01, %v410_v46  ;;  %1927 = vmatmul.mubr.msk.f32.gmra.mxu1 %vm872_vm4, %v808_v47  ;;  %v810_v53 = vsel %vm682_vm15, %v1827_v43, %v746_v45 }
  0xe8   :  { %v1830_v49 = vpop.f32.mrf.mxu0 }
  0xe9   :  { %v809_v50 = vsel %vm681_vm0, %v410_v46, %v745_v48  ;;  %v748_v51 = vmul.f32 0.01, %v1830_v49  ;;  %vm684_vm1 = vcmp.gt.f32.partialorder %v1830_v49, 0.0 }
  0xea   :  { %v420_v52 = vpop.f32.mrf.mxu0  ;;  %1929 = vmatprep.mubr.msk.f32.mxu1 %vm872_vm4, %v809_v50 }
  0xeb   :  { %vm683_vm2 = vcmp.gt.f32.partialorder %v420_v52, 0.0  ;;  %v747_v54 = vmul.f32 0.01, %v420_v52  ;;  %1930 = vmatmul.mubr.msk.f32.gmra.mxu1 %vm872_vm4, %v810_v53  ;;  %v812_v59 = vsel %vm684_vm1, %v1830_v49, %v748_v51 }
  0xec   :  { %v1833_v55 = vpop.f32.mrf.mxu0 }
  0xed   :  { %v811_v56 = vsel %vm683_vm2, %v420_v52, %v747_v54  ;;  %v750_v57 = vmul.f32 0.01, %v1833_v55  ;;  %vm686_vm3 = vcmp.gt.f32.partialorder %v1833_v55, 0.0 }
  0xee   :  { %v430_v58 = vpop.f32.mrf.mxu0  ;;  %1932 = vmatprep.mubr.msk.f32.mxu1 %vm872_vm4, %v811_v56 }
  0xef   :  { %vm685_vm5 = vcmp.gt.f32.partialorder %v430_v58, 0.0  ;;  %v749_v60 = vmul.f32 0.01, %v430_v58  ;;  %1933 = vmatmul.mubr.msk.f32.gmra.mxu1 %vm872_vm4, %v812_v59  ;;  %v814_v1 = vsel %vm686_vm3, %v1833_v55, %v750_v57 }
  0xf0   :  { %v1836_v61 = vpop.f32.mrf.mxu0 }
  0xf1   :  { %v813_v62 = vsel %vm685_vm5, %v430_v58, %v749_v60  ;;  %v752_v63 = vmul.f32 0.01, %v1836_v61  ;;  %vm688_vm6 = vcmp.gt.f32.partialorder %v1836_v61, 0.0 }
  0xf2   :  { %v440_v0 = vpop.f32.mrf.mxu0  ;;  %1935 = vmatprep.mubr.msk.f32.mxu1 %vm872_vm4, %v813_v62 }
  0xf3   :  { %vm687_vm7 = vcmp.gt.f32.partialorder %v440_v0, 0.0  ;;  %v751_v2 = vmul.f32 0.01, %v440_v0  ;;  %1936 = vmatmul.mubr.msk.f32.gmra.mxu1 %vm872_vm4, %v814_v1  ;;  %v816_v7 = vsel %vm688_vm6, %v1836_v61, %v752_v63 }
  0xf4   :  { %v1839_v3 = vpop.f32.mrf.mxu0 }
  0xf5   :  { %v815_v4 = vsel %vm687_vm7, %v440_v0, %v751_v2  ;;  %v754_v5 = vmul.f32 0.01, %v1839_v3  ;;  %vm690_vm8 = vcmp.gt.f32.partialorder %v1839_v3, 0.0 }
  0xf6   :  { %v450_v6 = vpop.f32.mrf.mxu0  ;;  %1938 = vmatprep.mubr.msk.f32.mxu1 %vm872_vm4, %v815_v4 }
  0xf7   :  { %vm689_vm9 = vcmp.gt.f32.partialorder %v450_v6, 0.0  ;;  %v753_v8 = vmul.f32 0.01, %v450_v6  ;;  %1939 = vmatmul.mubr.msk.f32.gmra.mxu1 %vm872_vm4, %v816_v7  ;;  %v818_v13 = vsel %vm690_vm8, %v1839_v3, %v754_v5 }
  0xf8   :  { %v1842_v9 = vpop.f32.mrf.mxu0 }
  0xf9   :  { %v817_v10 = vsel %vm689_vm9, %v450_v6, %v753_v8  ;;  %v756_v11 = vmul.f32 0.01, %v1842_v9  ;;  %vm692_vm10 = vcmp.gt.f32.partialorder %v1842_v9, 0.0 }
  0xfa   :  { %v460_v12 = vpop.f32.mrf.mxu0  ;;  %1941 = vmatprep.mubr.msk.f32.mxu1 %vm872_vm4, %v817_v10 }
  0xfb   :  { %vm691_vm11 = vcmp.gt.f32.partialorder %v460_v12, 0.0  ;;  %v755_v14 = vmul.f32 0.01, %v460_v12  ;;  %1942 = vmatmul.mubr.msk.f32.gmra.mxu1 %vm872_vm4, %v818_v13  ;;  %v820_v19 = vsel %vm692_vm10, %v1842_v9, %v756_v11 }
  0xfc   :  { %v1845_v15 = vpop.f32.mrf.mxu0 }
  0xfd   :  { %v819_v16 = vsel %vm691_vm11, %v460_v12, %v755_v14  ;;  %v758_v17 = vmul.f32 0.01, %v1845_v15  ;;  %vm694_vm12 = vcmp.gt.f32.partialorder %v1845_v15, 0.0 }
  0xfe   :  { %v470_v18 = vpop.f32.mrf.mxu0  ;;  %1944 = vmatprep.mubr.msk.f32.mxu1 %vm872_vm4, %v819_v16 }
  0xff   :  { %vm693_vm13 = vcmp.gt.f32.partialorder %v470_v18, 0.0  ;;  %v757_v20 = vmul.f32 0.01, %v470_v18  ;;  %1945 = vmatmul.mubr.msk.f32.gmra.mxu1 %vm872_vm4, %v820_v19  ;;  %v822_v25 = vsel %vm694_vm12, %v1845_v15, %v758_v17 }
 0x100   :  { %v1848_v21 = vpop.f32.mrf.mxu0 }
 0x101   :  { %v821_v22 = vsel %vm693_vm13, %v470_v18, %v757_v20  ;;  %v760_v23 = vmul.f32 0.01, %v1848_v21  ;;  %vm696_vm14 = vcmp.gt.f32.partialorder %v1848_v21, 0.0 }
 0x102   :  { %v480_v24 = vpop.f32.mrf.mxu0  ;;  %1947 = vmatprep.mubr.msk.f32.mxu1 %vm872_vm4, %v821_v22 }
 0x103   :  { %vm695_vm15 = vcmp.gt.f32.partialorder %v480_v24, 0.0  ;;  %v759_v26 = vmul.f32 0.01, %v480_v24  ;;  %1948 = vmatmul.mubr.msk.f32.gmra.mxu1 %vm872_vm4, %v822_v25  ;;  %v824_v31 = vsel %vm696_vm14, %v1848_v21, %v760_v23 }
 0x104   :  { %v1851_v27 = vpop.f32.mrf.mxu0 }
 0x105   :  { %v823_v28 = vsel %vm695_vm15, %v480_v24, %v759_v26  ;;  %v762_v29 = vmul.f32 0.01, %v1851_v27  ;;  %vm698_vm0 = vcmp.gt.f32.partialorder %v1851_v27, 0.0 }
 0x106   :  { %v490_v30 = vpop.f32.mrf.mxu0  ;;  %1950 = vmatprep.mubr.msk.f32.mxu1 %vm872_vm4, %v823_v28 }
 0x107   :  { %vm697_vm1 = vcmp.gt.f32.partialorder %v490_v30, 0.0  ;;  %v761_v32 = vmul.f32 0.01, %v490_v30  ;;  %1951 = vmatmul.mubr.msk.f32.gmra.mxu1 %vm872_vm4, %v824_v31  ;;  %v826_v37 = vsel %vm698_vm0, %v1851_v27, %v762_v29 }
 0x108   :  { %v1854_v33 = vpop.f32.mrf.mxu0 }
 0x109   :  { %v825_v34 = vsel %vm697_vm1, %v490_v30, %v761_v32  ;;  %v764_v35 = vmul.f32 0.01, %v1854_v33  ;;  %vm700_vm2 = vcmp.gt.f32.partialorder %v1854_v33, 0.0 }
 0x10a   :  { %v500_v36 = vpop.f32.mrf.mxu0  ;;  %1953 = vmatprep.mubr.msk.f32.mxu1 %vm872_vm4, %v825_v34 }
 0x10b   :  { %vm699_vm3 = vcmp.gt.f32.partialorder %v500_v36, 0.0  ;;  %v763_v38 = vmul.f32 0.01, %v500_v36  ;;  %1954 = vmatmul.mubr.msk.f32.gmra.mxu1 %vm872_vm4, %v826_v37  ;;  %v828_v43 = vsel %vm700_vm2, %v1854_v33, %v764_v35 }
 0x10c   :  { %v1857_v39 = vpop.f32.mrf.mxu0 }
 0x10d   :  { %v827_v40 = vsel %vm699_vm3, %v500_v36, %v763_v38  ;;  %v766_v41 = vmul.f32 0.01, %v1857_v39  ;;  %vm702_vm5 = vcmp.gt.f32.partialorder %v1857_v39, 0.0 }
 0x10e   :  { %v510_v42 = vpop.f32.mrf.mxu0  ;;  %1956 = vmatprep.mubr.msk.f32.mxu1 %vm872_vm4, %v827_v40 }
 0x10f   :  { %vm701_vm6 = vcmp.gt.f32.partialorder %v510_v42, 0.0  ;;  %v765_v44 = vmul.f32 0.01, %v510_v42  ;;  %1957 = vmatmul.mubr.msk.f32.gmra.mxu1 %vm872_vm4, %v828_v43  ;;  %v830_v49 = vsel %vm702_vm5, %v1857_v39, %v766_v41 }
 0x110   :  { %v1860_v45 = vpop.f32.mrf.mxu0 }
 0x111   :  { %v829_v46 = vsel %vm701_vm6, %v510_v42, %v765_v44  ;;  %v768_v47 = vmul.f32 0.01, %v1860_v45  ;;  %vm704_vm7 = vcmp.gt.f32.partialorder %v1860_v45, 0.0 }
 0x112   :  { %v520_v48 = vpop.f32.mrf.mxu0  ;;  %1959 = vmatprep.mubr.msk.f32.mxu1 %vm872_vm4, %v829_v46 }
 0x113   :  { %vm703_vm8 = vcmp.gt.f32.partialorder %v520_v48, 0.0  ;;  %v767_v50 = vmul.f32 0.01, %v520_v48  ;;  %1960 = vmatmul.mubr.msk.f32.gmra.mxu1 %vm872_vm4, %v830_v49  ;;  %v832_v55 = vsel %vm704_vm7, %v1860_v45, %v768_v47 }
 0x114   :  { %v1863_v51 = vpop.f32.mrf.mxu0 }
 0x115   :  { %v831_v52 = vsel %vm703_vm8, %v520_v48, %v767_v50  ;;  %v770_v53 = vmul.f32 0.01, %v1863_v51  ;;  %vm706_vm9 = vcmp.gt.f32.partialorder %v1863_v51, 0.0 }
 0x116   :  { %v530_v54 = vpop.f32.mrf.mxu0  ;;  %1962 = vmatprep.mubr.msk.f32.mxu1 %vm872_vm4, %v831_v52 }
 0x117   :  { %vm705_vm10 = vcmp.gt.f32.partialorder %v530_v54, 0.0  ;;  %v769_v56 = vmul.f32 0.01, %v530_v54  ;;  %1963 = vmatmul.mubr.msk.f32.gmra.mxu1 %vm872_vm4, %v832_v55  ;;  %v834_v61 = vsel %vm706_vm9, %v1863_v51, %v770_v53 }
 0x118   :  { %v1866_v57 = vpop.f32.mrf.mxu0 }
 0x119   :  { %v833_v58 = vsel %vm705_vm10, %v530_v54, %v769_v56  ;;  %v772_v59 = vmul.f32 0.01, %v1866_v57  ;;  %vm708_vm11 = vcmp.gt.f32.partialorder %v1866_v57, 0.0 }
 0x11a   :  { %v540_v60 = vpop.f32.mrf.mxu0  ;;  %1965 = vmatprep.mubr.msk.f32.mxu1 %vm872_vm4, %v833_v58 }
 0x11b   :  { %vm707_vm12 = vcmp.gt.f32.partialorder %v540_v60, 0.0  ;;  %v771_v62 = vmul.f32 0.01, %v540_v60  ;;  %1966 = vmatmul.mubr.msk.f32.gmra.mxu1 %vm872_vm4, %v834_v61  ;;  %v836_v3 = vsel %vm708_vm11, %v1866_v57, %v772_v59 }
 0x11c   :  { %v1869_v63 = vpop.f32.mrf.mxu0 }
 0x11d   :  { %v835_v0 = vsel %vm707_vm12, %v540_v60, %v771_v62  ;;  %v774_v1 = vmul.f32 0.01, %v1869_v63  ;;  %vm710_vm13 = vcmp.gt.f32.partialorder %v1869_v63, 0.0 }
 0x11e   :  { %v550_v2 = vpop.f32.mrf.mxu0  ;;  %1968 = vmatprep.mubr.msk.f32.mxu1 %vm872_vm4, %v835_v0 }
 0x11f   :  { %vm709_vm14 = vcmp.gt.f32.partialorder %v550_v2, 0.0  ;;  %v773_v4 = vmul.f32 0.01, %v550_v2  ;;  %1969 = vmatmul.mubr.msk.f32.gmra.mxu1 %vm872_vm4, %v836_v3  ;;  %v838_v9 = vsel %vm710_vm13, %v1869_v63, %v774_v1 }
 0x120   :  { %v1872_v5 = vpop.f32.mrf.mxu0 }
 0x121   :  { %v837_v6 = vsel %vm709_vm14, %v550_v2, %v773_v4  ;;  %v776_v7 = vmul.f32 0.01, %v1872_v5  ;;  %vm712_vm15 = vcmp.gt.f32.partialorder %v1872_v5, 0.0 }
 0x122   :  { %v560_v8 = vpop.f32.mrf.mxu0  ;;  %1971 = vmatprep.mubr.msk.f32.mxu1 %vm872_vm4, %v837_v6 }
 0x123   :  { %vm711_vm0 = vcmp.gt.f32.partialorder %v560_v8, 0.0  ;;  %v775_v10 = vmul.f32 0.01, %v560_v8  ;;  %1972 = vmatmul.mubr.msk.f32.gmra.mxu1 %vm872_vm4, %v838_v9  ;;  %v840_v15 = vsel %vm712_vm15, %v1872_v5, %v776_v7  ;;  %v2410_v9 = vld [vmem:[%s2482_s3] ss:$0 sm:$0xff]  ;;  %s2032_s3 = smov [#allocation2]  }
 0x124   :  { %v1875_v11 = vpop.f32.mrf.mxu0  ;;  %s1519_s25 = sshll.u32 %s2032_s3, 4  ;;  %s1520_s25 = int_to_ptr.vmem [resolvable:$true] %s1519_s25 }
 0x125   :  { %v839_v12 = vsel %vm711_vm0, %v560_v8, %v775_v10  ;;  %v778_v13 = vmul.f32 0.01, %v1875_v11  ;;  %vm714_vm1 = vcmp.gt.f32.partialorder %v1875_v11, 0.0  ;;  %s2010_s26 = scalar_lea.vmem %s1520_s25, 8192  ;;  %p2015_p1 = scmp.lt.s32.totalorder %s1520_s25, %s1520_s25 }
 0x126   :  { %v570_v14 = vpop.f32.mrf.mxu0  ;;  %1974 = vmatprep.mubr.msk.f32.mxu1 %vm872_vm4, %v839_v12  ;;  %p2011_p0 = scmp.ne.s32.totalorder %s1520_s25, %s2010_s26  ;;  %p2016_p2 = scmp.lt.s32.totalorder %s2010_s26, %s2010_s26 }
 0x127   :  { %vm713_vm2 = vcmp.gt.f32.partialorder %v570_v14, 0.0  ;;  %v777_v16 = vmul.f32 0.01, %v570_v14  ;;  %1975 = vmatmul.mubr.msk.f32.gmra.mxu1 %vm872_vm4, %v840_v15  ;;  %v842_v21 = vsel %vm714_vm1, %v1875_v11, %v778_v13 }
 0x128   :  { %v1878_v17 = vpop.f32.mrf.mxu0  ;;  %p2017_p3 = por %p2016_p2, %p2015_p1 }
 0x129   :  { %v841_v18 = vsel %vm713_vm2, %v570_v14, %v777_v16  ;;  %v780_v19 = vmul.f32 0.01, %v1878_v17  ;;  %vm716_vm3 = vcmp.gt.f32.partialorder %v1878_v17, 0.0 }
 0x12a   :  { %v580_v20 = vpop.f32.mrf.mxu0  ;;  %1977 = vmatprep.mubr.msk.f32.mxu1 %vm872_vm4, %v841_v18  ;;  %p2018_p4 = pnand %p2017_p3, %p2011_p0 }
 0x12b   :  { %vm715_vm5 = vcmp.gt.f32.partialorder %v580_v20, 0.0  ;;  %v779_v22 = vmul.f32 0.01, %v580_v20  ;;  %1978 = vmatmul.mubr.msk.f32.gmra.mxu1 %vm872_vm4, %v842_v21  ;;  %v844_v27 = vsel %vm716_vm3, %v1878_v17, %v780_v19 }
 0x12c   :  { %v1881_v23 = vpop.f32.mrf.mxu0 }
 0x12d   :  { %v843_v24 = vsel %vm715_vm5, %v580_v20, %v779_v22  ;;  %v782_v25 = vmul.f32 0.01, %v1881_v23  ;;  %vm718_vm6 = vcmp.gt.f32.partialorder %v1881_v23, 0.0 }
 0x12e   :  { %v590_v26 = vpop.f32.mrf.mxu0  ;;  %1980 = vmatprep.mubr.msk.f32.mxu1 %vm872_vm4, %v843_v24 }
 0x12f   :  { %vm717_vm7 = vcmp.gt.f32.partialorder %v590_v26, 0.0  ;;  %v781_v28 = vmul.f32 0.01, %v590_v26  ;;  %1981 = vmatmul.mubr.msk.f32.gmra.mxu1 %vm872_vm4, %v844_v27  ;;  %v846_v33 = vsel %vm718_vm6, %v1881_v23, %v782_v25 }
 0x130   :  { %v1884_v29 = vpop.f32.mrf.mxu0 }
 0x131   :  { %v845_v30 = vsel %vm717_vm7, %v590_v26, %v781_v28  ;;  %v784_v31 = vmul.f32 0.01, %v1884_v29  ;;  %vm720_vm8 = vcmp.gt.f32.partialorder %v1884_v29, 0.0 }
 0x132   :  { %v600_v32 = vpop.f32.mrf.mxu0  ;;  %1983 = vmatprep.mubr.msk.f32.mxu1 %vm872_vm4, %v845_v30 }
 0x133   :  { %vm719_vm9 = vcmp.gt.f32.partialorder %v600_v32, 0.0  ;;  %v783_v34 = vmul.f32 0.01, %v600_v32  ;;  %1984 = vmatmul.mubr.msk.f32.gmra.mxu1 %vm872_vm4, %v846_v33  ;;  %v848_v39 = vsel %vm720_vm8, %v1884_v29, %v784_v31 }
 0x134   :  { %v1887_v35 = vpop.f32.mrf.mxu0 }
 0x135   :  { %v847_v36 = vsel %vm719_vm9, %v600_v32, %v783_v34  ;;  %v786_v37 = vmul.f32 0.01, %v1887_v35  ;;  %vm722_vm10 = vcmp.gt.f32.partialorder %v1887_v35, 0.0 }
 0x136   :  { %v610_v38 = vpop.f32.mrf.mxu0  ;;  %1986 = vmatprep.mubr.msk.f32.mxu1 %vm872_vm4, %v847_v36 }
 0x137   :  { %vm721_vm11 = vcmp.gt.f32.partialorder %v610_v38, 0.0  ;;  %v785_v40 = vmul.f32 0.01, %v610_v38  ;;  %1987 = vmatmul.mubr.msk.f32.gmra.mxu1 %vm872_vm4, %v848_v39  ;;  %v850_v45 = vsel %vm722_vm10, %v1887_v35, %v786_v37 }
 0x138   :  { %v1890_v41 = vpop.f32.mrf.mxu0 }
 0x139   :  { %v849_v42 = vsel %vm721_vm11, %v610_v38, %v785_v40  ;;  %v788_v43 = vmul.f32 0.01, %v1890_v41  ;;  %vm724_vm12 = vcmp.gt.f32.partialorder %v1890_v41, 0.0 }
 0x13a   :  { %v620_v44 = vpop.f32.mrf.mxu0  ;;  %1989 = vmatprep.mubr.msk.f32.mxu1 %vm872_vm4, %v849_v42 }
 0x13b   :  { %vm723_vm13 = vcmp.gt.f32.partialorder %v620_v44, 0.0  ;;  %v787_v46 = vmul.f32 0.01, %v620_v44  ;;  %1990 = vmatmul.mubr.msk.f32.gmra.mxu1 %vm872_vm4, %v850_v45  ;;  %v852_v51 = vsel %vm724_vm12, %v1890_v41, %v788_v43 }
 0x13c   :  { %v1893_v47 = vpop.f32.mrf.mxu0 }
 0x13d   :  { %v851_v48 = vsel %vm723_vm13, %v620_v44, %v787_v46  ;;  %v790_v49 = vmul.f32 0.01, %v1893_v47  ;;  %vm726_vm14 = vcmp.gt.f32.partialorder %v1893_v47, 0.0 }
 0x13e   :  { %v630_v50 = vpop.f32.mrf.mxu0  ;;  %1992 = vmatprep.mubr.msk.f32.mxu1 %vm872_vm4, %v851_v48 }
 0x13f   :  { %vm725_vm15 = vcmp.gt.f32.partialorder %v630_v50, 0.0  ;;  %v789_v52 = vmul.f32 0.01, %v630_v50  ;;  %1993 = vmatmul.mubr.msk.f32.gmra.mxu1 %vm872_vm4, %v852_v51  ;;  %v854_v57 = vsel %vm726_vm14, %v1893_v47, %v790_v49 }
 0x140   :  { %v1896_v53 = vpop.f32.mrf.mxu0 }
 0x141   :  { %v853_v54 = vsel %vm725_vm15, %v630_v50, %v789_v52  ;;  %v792_v55 = vmul.f32 0.01, %v1896_v53  ;;  %vm728_vm0 = vcmp.gt.f32.partialorder %v1896_v53, 0.0 }
 0x142   :  { %v640_v56 = vpop.f32.mrf.mxu0  ;;  %1995 = vmatprep.mubr.msk.f32.mxu1 %vm872_vm4, %v853_v54 }
 0x143   :  { %vm727_vm1 = vcmp.gt.f32.partialorder %v640_v56, 0.0  ;;  %v791_v58 = vmul.f32 0.01, %v640_v56  ;;  %1996 = vmatmul.mubr.msk.f32.gmra.mxu1 %vm872_vm4, %v854_v57  ;;  %v856_v63 = vsel %vm728_vm0, %v1896_v53, %v792_v55 }
 0x144   :  { %v1899_v59 = vpop.f32.mrf.mxu0 }
 0x145   :  { %v855_v60 = vsel %vm727_vm1, %v640_v56, %v791_v58  ;;  %v794_v61 = vmul.f32 0.01, %v1899_v59  ;;  %vm730_vm2 = vcmp.gt.f32.partialorder %v1899_v59, 0.0 }
 0x146   :  { %v650_v62 = vpop.f32.mrf.mxu0  ;;  %1998 = vmatprep.mubr.msk.f32.mxu1 %vm872_vm4, %v855_v60 }
 0x147   :  { %vm729_vm3 = vcmp.gt.f32.partialorder %v650_v62, 0.0  ;;  %v793_v0 = vmul.f32 0.01, %v650_v62  ;;  %1999 = vmatmul.mubr.msk.f32.gmra.mxu1 %vm872_vm4, %v856_v63  ;;  %v858_v5 = vsel %vm730_vm2, %v1899_v59, %v794_v61 }
 0x148   :  { %v1902_v1 = vpop.f32.mrf.mxu0 }
 0x149   :  { %v857_v2 = vsel %vm729_vm3, %v650_v62, %v793_v0  ;;  %v796_v3 = vmul.f32 0.01, %v1902_v1  ;;  %vm732_vm5 = vcmp.gt.f32.partialorder %v1902_v1, 0.0 }
 0x14a   :  { %v660_v4 = vpop.f32.mrf.mxu0  ;;  %2001 = vmatprep.mubr.msk.f32.mxu1 %vm872_vm4, %v857_v2 }
 0x14b   :  { %vm731_vm6 = vcmp.gt.f32.partialorder %v660_v4, 0.0  ;;  %v795_v6 = vmul.f32 0.01, %v660_v4  ;;  %2002 = vmatmul.mubr.msk.f32.gmra.mxu1 %vm872_vm4, %v858_v5  ;;  %v860_v8 = vsel %vm732_vm5, %v1902_v1, %v796_v3 }
 0x14d   :  { %v859_v7 = vsel %vm731_vm6, %v660_v4, %v795_v6 }
 0x14e   :  { %2004 = vmatprep.mubr.msk.f32.mxu1 %vm872_vm4, %v859_v7 }
 0x14f   :  { %2005 = vmatmul.mubr.msk.f32.gmra.mxu1 %vm872_vm4, %v860_v8 }
 0x193   :  { %v1913_v10 = vpop.f32.mrf.mxu1 }
 0x194   :  { %v1137_v11 = vadd.f32 %v1913_v10, %v2410_v9 }
 0x195   :  { %v1131_v12 = vpop.f32.mrf.mxu1 }
 0x196   :  { %1451 = vst [vmem:[#allocation2 + $0x8] sm:$0xff] %v1137_v11  ;;  %v1132_v13 = vadd.f32 %v2410_v9, %v1131_v12 }
 0x197   :  { %v1916_v14 = vpop.f32.mrf.mxu1 }
 0x198   :  { %1450 = vst [vmem:[#allocation2] sm:$0xff] %v1132_v13  ;;  %v1147_v15 = vadd.f32 %v1916_v14, %v2410_v9 }
 0x199   :  { %v1141_v16 = vpop.f32.mrf.mxu1 }
 0x19a   :  { %1453 = vst [vmem:[#allocation2 + $0x18] sm:$0xff] %v1147_v15  ;;  %v1142_v17 = vadd.f32 %v2410_v9, %v1141_v16 }
 0x19b   :  { %v1919_v18 = vpop.f32.mrf.mxu1 }
 0x19c   :  { %1452 = vst [vmem:[#allocation2 + $0x10] sm:$0xff] %v1142_v17  ;;  %v1157_v19 = vadd.f32 %v1919_v18, %v2410_v9 }
 0x19d   :  { %v1151_v20 = vpop.f32.mrf.mxu1 }
 0x19e   :  { %1455 = vst [vmem:[#allocation2 + $0x28] sm:$0xff] %v1157_v19  ;;  %v1152_v21 = vadd.f32 %v2410_v9, %v1151_v20 }
 0x19f   :  { %v1922_v22 = vpop.f32.mrf.mxu1 }
 0x1a0   :  { %1454 = vst [vmem:[#allocation2 + $0x20] sm:$0xff] %v1152_v21  ;;  %v1167_v23 = vadd.f32 %v1922_v22, %v2410_v9 }
 0x1a1   :  { %v1161_v24 = vpop.f32.mrf.mxu1 }
 0x1a2   :  { %1457 = vst [vmem:[#allocation2 + $0x38] sm:$0xff] %v1167_v23  ;;  %v1162_v25 = vadd.f32 %v2410_v9, %v1161_v24 }
 0x1a3   :  { %v1925_v26 = vpop.f32.mrf.mxu1 }
 0x1a4   :  { %1456 = vst [vmem:[#allocation2 + $0x30] sm:$0xff] %v1162_v25  ;;  %v1177_v27 = vadd.f32 %v1925_v26, %v2410_v9 }
 0x1a5   :  { %v1171_v28 = vpop.f32.mrf.mxu1 }
 0x1a6   :  { %1459 = vst [vmem:[#allocation2 + $0x48] sm:$0xff] %v1177_v27  ;;  %v1172_v29 = vadd.f32 %v2410_v9, %v1171_v28 }
 0x1a7   :  { %v1928_v30 = vpop.f32.mrf.mxu1 }
 0x1a8   :  { %1458 = vst [vmem:[#allocation2 + $0x40] sm:$0xff] %v1172_v29  ;;  %v1187_v31 = vadd.f32 %v1928_v30, %v2410_v9 }
 0x1a9   :  { %v1181_v32 = vpop.f32.mrf.mxu1 }
 0x1aa   :  { %1461 = vst [vmem:[#allocation2 + $0x58] sm:$0xff] %v1187_v31  ;;  %v1182_v33 = vadd.f32 %v2410_v9, %v1181_v32 }
 0x1ab   :  { %v1931_v34 = vpop.f32.mrf.mxu1 }
 0x1ac   :  { %1460 = vst [vmem:[#allocation2 + $0x50] sm:$0xff] %v1182_v33  ;;  %v1197_v35 = vadd.f32 %v1931_v34, %v2410_v9 }
 0x1ad   :  { %v1191_v36 = vpop.f32.mrf.mxu1 }
 0x1ae   :  { %1463 = vst [vmem:[#allocation2 + $0x68] sm:$0xff] %v1197_v35  ;;  %v1192_v37 = vadd.f32 %v2410_v9, %v1191_v36 }
 0x1af   :  { %v1934_v38 = vpop.f32.mrf.mxu1 }
 0x1b0   :  { %1462 = vst [vmem:[#allocation2 + $0x60] sm:$0xff] %v1192_v37  ;;  %v1207_v39 = vadd.f32 %v1934_v38, %v2410_v9 }
 0x1b1   :  { %v1201_v40 = vpop.f32.mrf.mxu1 }
 0x1b2   :  { %1465 = vst [vmem:[#allocation2 + $0x78] sm:$0xff] %v1207_v39  ;;  %v1202_v41 = vadd.f32 %v2410_v9, %v1201_v40 }
 0x1b3   :  { %v1937_v42 = vpop.f32.mrf.mxu1 }
 0x1b4   :  { %1464 = vst [vmem:[#allocation2 + $0x70] sm:$0xff] %v1202_v41  ;;  %v1217_v43 = vadd.f32 %v1937_v42, %v2410_v9 }
 0x1b5   :  { %v1211_v44 = vpop.f32.mrf.mxu1 }
 0x1b6   :  { %1467 = vst [vmem:[#allocation2 + $0x88] sm:$0xff] %v1217_v43  ;;  %v1212_v45 = vadd.f32 %v2410_v9, %v1211_v44 }
 0x1b7   :  { %v1940_v46 = vpop.f32.mrf.mxu1 }
 0x1b8   :  { %1466 = vst [vmem:[#allocation2 + $0x80] sm:$0xff] %v1212_v45  ;;  %v1227_v47 = vadd.f32 %v1940_v46, %v2410_v9 }
 0x1b9   :  { %v1221_v48 = vpop.f32.mrf.mxu1 }
 0x1ba   :  { %1469 = vst [vmem:[#allocation2 + $0x98] sm:$0xff] %v1227_v47  ;;  %v1222_v49 = vadd.f32 %v2410_v9, %v1221_v48 }
 0x1bb   :  { %v1943_v50 = vpop.f32.mrf.mxu1 }
 0x1bc   :  { %1468 = vst [vmem:[#allocation2 + $0x90] sm:$0xff] %v1222_v49  ;;  %v1237_v51 = vadd.f32 %v1943_v50, %v2410_v9 }
 0x1bd   :  { %v1231_v52 = vpop.f32.mrf.mxu1 }
 0x1be   :  { %1471 = vst [vmem:[#allocation2 + $0xa8] sm:$0xff] %v1237_v51  ;;  %v1232_v53 = vadd.f32 %v2410_v9, %v1231_v52 }
 0x1bf   :  { %v1946_v54 = vpop.f32.mrf.mxu1 }
 0x1c0   :  { %1470 = vst [vmem:[#allocation2 + $0xa0] sm:$0xff] %v1232_v53  ;;  %v1247_v55 = vadd.f32 %v1946_v54, %v2410_v9 }
 0x1c1   :  { %v1241_v56 = vpop.f32.mrf.mxu1 }
 0x1c2   :  { %1473 = vst [vmem:[#allocation2 + $0xb8] sm:$0xff] %v1247_v55  ;;  %v1242_v57 = vadd.f32 %v2410_v9, %v1241_v56 }
 0x1c3   :  { %v1949_v58 = vpop.f32.mrf.mxu1 }
 0x1c4   :  { %1472 = vst [vmem:[#allocation2 + $0xb0] sm:$0xff] %v1242_v57  ;;  %v1257_v59 = vadd.f32 %v1949_v58, %v2410_v9 }
 0x1c5   :  { %v1251_v60 = vpop.f32.mrf.mxu1 }
 0x1c6   :  { %1475 = vst [vmem:[#allocation2 + $0xc8] sm:$0xff] %v1257_v59  ;;  %v1252_v61 = vadd.f32 %v2410_v9, %v1251_v60 }
 0x1c7   :  { %v1952_v62 = vpop.f32.mrf.mxu1 }
 0x1c8   :  { %1474 = vst [vmem:[#allocation2 + $0xc0] sm:$0xff] %v1252_v61  ;;  %v1267_v63 = vadd.f32 %v1952_v62, %v2410_v9 }
 0x1c9   :  { %v1261_v0 = vpop.f32.mrf.mxu1 }
 0x1ca   :  { %1477 = vst [vmem:[#allocation2 + $0xd8] sm:$0xff] %v1267_v63  ;;  %v1262_v1 = vadd.f32 %v2410_v9, %v1261_v0 }
 0x1cb   :  { %v1955_v2 = vpop.f32.mrf.mxu1 }
 0x1cc   :  { %1476 = vst [vmem:[#allocation2 + $0xd0] sm:$0xff] %v1262_v1  ;;  %v1277_v3 = vadd.f32 %v1955_v2, %v2410_v9 }
 0x1cd   :  { %v1271_v4 = vpop.f32.mrf.mxu1 }
 0x1ce   :  { %1479 = vst [vmem:[#allocation2 + $0xe8] sm:$0xff] %v1277_v3  ;;  %v1272_v5 = vadd.f32 %v2410_v9, %v1271_v4 }
 0x1cf   :  { %v1958_v6 = vpop.f32.mrf.mxu1 }
 0x1d0   :  { %1478 = vst [vmem:[#allocation2 + $0xe0] sm:$0xff] %v1272_v5  ;;  %v1287_v7 = vadd.f32 %v1958_v6, %v2410_v9 }
 0x1d1   :  { %v1281_v8 = vpop.f32.mrf.mxu1 }
 0x1d2   :  { %1481 = vst [vmem:[#allocation2 + $0xf8] sm:$0xff] %v1287_v7  ;;  %v1282_v10 = vadd.f32 %v2410_v9, %v1281_v8 }
 0x1d3   :  { %v1961_v11 = vpop.f32.mrf.mxu1 }
 0x1d4   :  { %1480 = vst [vmem:[#allocation2 + $0xf0] sm:$0xff] %v1282_v10  ;;  %v1297_v12 = vadd.f32 %v1961_v11, %v2410_v9 }
 0x1d5   :  { %v1291_v13 = vpop.f32.mrf.mxu1 }
 0x1d6   :  { %1483 = vst [vmem:[#allocation2 + $0x108] sm:$0xff] %v1297_v12  ;;  %v1292_v14 = vadd.f32 %v2410_v9, %v1291_v13 }
 0x1d7   :  { %v1964_v15 = vpop.f32.mrf.mxu1 }
 0x1d8   :  { %1482 = vst [vmem:[#allocation2 + $0x100] sm:$0xff] %v1292_v14  ;;  %v1307_v16 = vadd.f32 %v1964_v15, %v2410_v9 }
 0x1d9   :  { %v1301_v17 = vpop.f32.mrf.mxu1 }
 0x1da   :  { %1485 = vst [vmem:[#allocation2 + $0x118] sm:$0xff] %v1307_v16  ;;  %v1302_v18 = vadd.f32 %v2410_v9, %v1301_v17 }
 0x1db   :  { %v1967_v19 = vpop.f32.mrf.mxu1 }
 0x1dc   :  { %1484 = vst [vmem:[#allocation2 + $0x110] sm:$0xff] %v1302_v18  ;;  %v1317_v20 = vadd.f32 %v1967_v19, %v2410_v9 }
 0x1dd   :  { %v1311_v21 = vpop.f32.mrf.mxu1 }
 0x1de   :  { %1487 = vst [vmem:[#allocation2 + $0x128] sm:$0xff] %v1317_v20  ;;  %v1312_v22 = vadd.f32 %v2410_v9, %v1311_v21 }
 0x1df   :  { %v1970_v23 = vpop.f32.mrf.mxu1 }
 0x1e0   :  { %1486 = vst [vmem:[#allocation2 + $0x120] sm:$0xff] %v1312_v22  ;;  %v1327_v24 = vadd.f32 %v1970_v23, %v2410_v9 }
 0x1e1   :  { %v1321_v25 = vpop.f32.mrf.mxu1 }
 0x1e2   :  { %1489 = vst [vmem:[#allocation2 + $0x138] sm:$0xff] %v1327_v24  ;;  %v1322_v26 = vadd.f32 %v2410_v9, %v1321_v25 }
 0x1e3   :  { %v1973_v27 = vpop.f32.mrf.mxu1 }
 0x1e4   :  { %1488 = vst [vmem:[#allocation2 + $0x130] sm:$0xff] %v1322_v26  ;;  %v1337_v28 = vadd.f32 %v1973_v27, %v2410_v9 }
 0x1e5   :  { %v1331_v29 = vpop.f32.mrf.mxu1 }
 0x1e6   :  { %1491 = vst [vmem:[#allocation2 + $0x148] sm:$0xff] %v1337_v28  ;;  %v1332_v30 = vadd.f32 %v2410_v9, %v1331_v29 }
 0x1e7   :  { %v1976_v31 = vpop.f32.mrf.mxu1 }
 0x1e8   :  { %1490 = vst [vmem:[#allocation2 + $0x140] sm:$0xff] %v1332_v30  ;;  %v1347_v32 = vadd.f32 %v1976_v31, %v2410_v9 }
 0x1e9   :  { %v1341_v33 = vpop.f32.mrf.mxu1 }
 0x1ea   :  { %1493 = vst [vmem:[#allocation2 + $0x158] sm:$0xff] %v1347_v32  ;;  %v1342_v34 = vadd.f32 %v2410_v9, %v1341_v33 }
 0x1eb   :  { %v1979_v35 = vpop.f32.mrf.mxu1 }
 0x1ec   :  { %1492 = vst [vmem:[#allocation2 + $0x150] sm:$0xff] %v1342_v34  ;;  %v1357_v36 = vadd.f32 %v1979_v35, %v2410_v9 }
 0x1ed   :  { %v1351_v37 = vpop.f32.mrf.mxu1 }
 0x1ee   :  { %1495 = vst [vmem:[#allocation2 + $0x168] sm:$0xff] %v1357_v36  ;;  %v1352_v38 = vadd.f32 %v2410_v9, %v1351_v37 }
 0x1ef   :  { %v1982_v39 = vpop.f32.mrf.mxu1 }
 0x1f0   :  { %1494 = vst [vmem:[#allocation2 + $0x160] sm:$0xff] %v1352_v38  ;;  %v1367_v40 = vadd.f32 %v1982_v39, %v2410_v9 }
 0x1f1   :  { %v1361_v41 = vpop.f32.mrf.mxu1 }
 0x1f2   :  { %1497 = vst [vmem:[#allocation2 + $0x178] sm:$0xff] %v1367_v40  ;;  %v1362_v42 = vadd.f32 %v2410_v9, %v1361_v41 }
 0x1f3   :  { %v1985_v43 = vpop.f32.mrf.mxu1 }
 0x1f4   :  { %1496 = vst [vmem:[#allocation2 + $0x170] sm:$0xff] %v1362_v42  ;;  %v1377_v44 = vadd.f32 %v1985_v43, %v2410_v9 }
 0x1f5   :  { %v1371_v45 = vpop.f32.mrf.mxu1 }
 0x1f6   :  { %1499 = vst [vmem:[#allocation2 + $0x188] sm:$0xff] %v1377_v44  ;;  %v1372_v46 = vadd.f32 %v2410_v9, %v1371_v45 }
 0x1f7   :  { %v1988_v47 = vpop.f32.mrf.mxu1 }
 0x1f8   :  { %1498 = vst [vmem:[#allocation2 + $0x180] sm:$0xff] %v1372_v46  ;;  %v1387_v48 = vadd.f32 %v1988_v47, %v2410_v9 }
 0x1f9   :  { %v1381_v49 = vpop.f32.mrf.mxu1 }
 0x1fa   :  { %1501 = vst [vmem:[#allocation2 + $0x198] sm:$0xff] %v1387_v48  ;;  %v1382_v50 = vadd.f32 %v2410_v9, %v1381_v49 }
 0x1fb   :  { %v1991_v51 = vpop.f32.mrf.mxu1 }
 0x1fc   :  { %1500 = vst [vmem:[#allocation2 + $0x190] sm:$0xff] %v1382_v50  ;;  %v1397_v52 = vadd.f32 %v1991_v51, %v2410_v9 }
 0x1fd   :  { %v1391_v53 = vpop.f32.mrf.mxu1 }
 0x1fe   :  { %1503 = vst [vmem:[#allocation2 + $0x1a8] sm:$0xff] %v1397_v52  ;;  %v1392_v54 = vadd.f32 %v2410_v9, %v1391_v53 }
 0x1ff   :  { %v1994_v55 = vpop.f32.mrf.mxu1 }
 0x200   :  { %1502 = vst [vmem:[#allocation2 + $0x1a0] sm:$0xff] %v1392_v54  ;;  %v1407_v56 = vadd.f32 %v1994_v55, %v2410_v9 }
 0x201   :  { %v1401_v57 = vpop.f32.mrf.mxu1 }
 0x202   :  { %1505 = vst [vmem:[#allocation2 + $0x1b8] sm:$0xff] %v1407_v56  ;;  %v1402_v58 = vadd.f32 %v2410_v9, %v1401_v57 }
 0x203   :  { %v1997_v59 = vpop.f32.mrf.mxu1 }
 0x204   :  { %1504 = vst [vmem:[#allocation2 + $0x1b0] sm:$0xff] %v1402_v58  ;;  %v1417_v60 = vadd.f32 %v1997_v59, %v2410_v9 }
 0x205   :  { %v1411_v61 = vpop.f32.mrf.mxu1 }
 0x206   :  { %1507 = vst [vmem:[#allocation2 + $0x1c8] sm:$0xff] %v1417_v60  ;;  %v1412_v62 = vadd.f32 %v2410_v9, %v1411_v61 }
 0x207   :  { %v2000_v63 = vpop.f32.mrf.mxu1 }
 0x208   :  { %1506 = vst [vmem:[#allocation2 + $0x1c0] sm:$0xff] %v1412_v62  ;;  %v1427_v0 = vadd.f32 %v2000_v63, %v2410_v9 }
 0x209   :  { %v1421_v1 = vpop.f32.mrf.mxu1 }
 0x20a   :  { %1509 = vst [vmem:[#allocation2 + $0x1d8] sm:$0xff] %v1427_v0  ;;  %v1422_v2 = vadd.f32 %v2410_v9, %v1421_v1 }
 0x20b   :  { %v2003_v3 = vpop.f32.mrf.mxu1 }
 0x20c   :  { %1508 = vst [vmem:[#allocation2 + $0x1d0] sm:$0xff] %v1422_v2  ;;  %v1437_v4 = vadd.f32 %v2003_v3, %v2410_v9 }
 0x20d   :  { %v1431_v5 = vpop.f32.mrf.mxu1 }
 0x20e   :  { %1511 = vst [vmem:[#allocation2 + $0x1e8] sm:$0xff] %v1437_v4  ;;  %v1432_v6 = vadd.f32 %v2410_v9, %v1431_v5 }
 0x20f   :  { %v2006_v7 = vpop.f32.mrf.mxu1 }
 0x210   :  { %1510 = vst [vmem:[#allocation2 + $0x1e0] sm:$0xff] %v1432_v6  ;;  %v1447_v8 = vadd.f32 %v2006_v7, %v2410_v9 }
 0x211   :  { %v1441_v10 = vpop.f32.mrf.mxu1 }
 0x212   :  { %1513 = vst [vmem:[#allocation2 + $0x1f8] sm:$0xff] %v1447_v8  ;;  %v1442_v11 = vadd.f32 %v2410_v9, %v1441_v10 }
 0x214   :  { %1512 = vst [vmem:[#allocation2 + $0x1f0] sm:$0xff] %v1442_v11 }
 0x215   :  { %2021 = shalt.err (!%p2018_p4)
}
 0x216   :  { %s2033_s27 = smov 128   ;;  %s2034_s28 = smov 8  }
 0x217   :  { %1525 = dma.vmem_to_hbm [thread:$0]  %s1520_s25, 8192, %s2483_s4, [#allocation3], %s2033_s27, %s2033_s27, %s2034_s28  }
 0x218   :  { %2030 = dma.done.wait [#allocation3], 8192  }
 0x219   :  { %2031 = vsyncadd [#allocation3], 4294959104 }
 0x21a   :  { %1529 = vsyncpa [#allocation3], 1 }

</bundles_post_ra>
